<compile_context>
chip_gen: v5e
topology: v5e:2x2
jax: 0.10.0
libtpu: 0.0.40
codegen_flags: <defaults>
</compile_context>

<pallas_src>
import functools

import jax
import jax.numpy as jnp
from jax.experimental import pallas as pl
from jax.experimental.pallas import tpu as pltpu


_TILE_B_MAX = 8192          # rows per grid step (multiple of 128): ~4 MiB x tile after lane padding
_MIN_PALLAS_ROWS = 1024     # below this, plain XLA beats kernel launch + grid setup
_VMEM_LIMIT_BYTES = 32 * 1024 * 1024  # safe on v5e (128 MiB phys), v6e (128), v7x (64)


def _mlp_kernel(x_ref, w1_ref, b1_ref, w2_ref, b2_ref, o_ref):
    # Layer 1 on the MXU (f32 accumulate), feature-major result [H, TILE_B] so the
    # batch sits on the lane axis and the final store is lane-dense.
    # lhs = w1 [H, D] is (M, K); rhs = x [TILE_B, D] is (N, K) -> matmul with
    # transpose_rhs, the same pattern as q @ k.T in flash attention, which Mosaic
    # feeds to the MXU without materializing a transpose of the big x tile.
    # TODO(synk): confirm via pl.lower_as_mlir / bundle dump that no O(TILE_B*D)
    # vxpose relayout of x is emitted once tiles are this large.
    h = jax.lax.dot_general(
        w1_ref[...], x_ref[...],
        dimension_numbers=(((1,), (1,)), ((), ())),
        preferred_element_type=jnp.float32,
    )
    h = jnp.maximum(h + b1_ref[...], 0.0)                   # [H, TILE_B] + [H, 1]
    # Layer 2 (H -> 1): VPU multiply + sublane (XLU) reduce; no N=1 MXU matmul.
    y = jnp.sum(h * w2_ref[...], axis=0, keepdims=True)     # [1, TILE_B]
    o_ref[...] = (y + b2_ref[0, 0]).astype(o_ref.dtype)     # b2: scalar read from SMEM


_CORE_PARALLEL_OK = None


def _core_parallel_supported():
    """One-time probe: can this chip / JAX build lower CORE_PARALLEL grid semantics?"""
    global _CORE_PARALLEL_OK
    if _CORE_PARALLEL_OK is None:
        try:
            def _probe(x_ref, o_ref):
                o_ref[...] = x_ref[...] + 1.0

            out = pl.pallas_call(
                _probe,
                out_shape=jax.ShapeDtypeStruct((24, 128), jnp.float32),
                grid=(3,),
                in_specs=[pl.BlockSpec((8, 128), lambda i: (i, 0))],
                out_specs=pl.BlockSpec((8, 128), lambda i: (i, 0)),
                compiler_params=pltpu.CompilerParams(
                    dimension_semantics=(pltpu.CORE_PARALLEL,)),
            )(jnp.zeros((24, 128), jnp.float32))
            _CORE_PARALLEL_OK = bool(jnp.all(out == 1.0))
        except Exception:
            _CORE_PARALLEL_OK = False
    return _CORE_PARALLEL_OK


@functools.partial(jax.jit, static_argnames=("tile_b", "core_parallel"))
def _forward_pallas(x, w1, b1, w2, b2, *, tile_b, core_parallel):
    """x: [B, D]; w1: [H, D]; b1: [H, 1]; w2: [H, 1]; b2: [1, 1]  ->  [B] (scalar if B==1)."""
    B, D = x.shape
    H = w1.shape[0]
    num_tiles = pl.cdiv(B, tile_b)   # ragged last tile handled by Pallas boundary masking
    batch_sem = pltpu.CORE_PARALLEL if core_parallel else pltpu.PARALLEL

    y = pl.pallas_call(
        _mlp_kernel,
        out_shape=jax.ShapeDtypeStruct((1, B), jnp.float32),
        grid=(num_tiles,),
        in_specs=[
            pl.BlockSpec((tile_b, D), lambda i: (i, 0)),         # x tile (pipelined)
            pl.BlockSpec((H, D), lambda i: (0, 0)),              # w1 (VMEM-resident)
            pl.BlockSpec((H, 1), lambda i: (0, 0)),              # b1 (column)
            pl.BlockSpec((H, 1), lambda i: (0, 0)),              # w2 (column)
            pl.BlockSpec(memory_space=pltpu.MemorySpace.SMEM),   # b2 scalar
        ],
        out_specs=pl.BlockSpec((1, tile_b), lambda i: (0, i)),   # lane-dense output row
        compiler_params=pltpu.CompilerParams(
            dimension_semantics=(batch_sem,),
            vmem_limit_bytes=_VMEM_LIMIT_BYTES),
    )(x, w1, b1, w2, b2)

    # nn.Sequential output is [B, 1]; .squeeze() -> [B] (0-d scalar if B == 1).
    return jnp.squeeze(y)


def torch_mlp_forward_pallas(x, w1, b1, w2, b2):
    """Always use the Pallas kernel (tile selection is shape-driven)."""
    B = x.shape[0]
    tile_b = _TILE_B_MAX if B >= _TILE_B_MAX else B   # single full-array block when small
    return _forward_pallas(x, w1, b1, w2, b2,
                           tile_b=tile_b,
                           core_parallel=_core_parallel_supported())


@jax.jit
def _forward_xla(x, w1, b1, w2, b2):
    h = jnp.maximum(x @ w1.T + b1[:, 0], 0.0)
    return jnp.squeeze(h @ w2 + b2[0, 0])


def torch_mlp_forward(x, w1, b1, w2, b2):
    """Dispatcher: tiny batches are launch-overhead dominated -> plain XLA."""
    if x.shape[0] < _MIN_PALLAS_ROWS:
        return _forward_xla(x, w1, b1, w2, b2)
    return torch_mlp_forward_pallas(x, w1, b1, w2, b2)


def init_params(key, input_dim, hidden_dim):
    """PyTorch nn.Linear default init: uniform(-1/sqrt(fan_in), 1/sqrt(fan_in)).
    w1 uses the native [out, in] layout; w2/b1 are stored as columns."""
    k1, k2, k3, k4 = jax.random.split(key, 4)
    bound1 = 1.0 / (input_dim ** 0.5)
    bound2 = 1.0 / (hidden_dim ** 0.5)
    w1 = jax.random.uniform(k1, (hidden_dim, input_dim), jnp.float32, -bound1, bound1)
    b1 = jax.random.uniform(k2, (hidden_dim, 1), jnp.float32, -bound1, bound1)
    w2 = jax.random.uniform(k3, (hidden_dim, 1), jnp.float32, -bound2, bound2)
    b2 = jax.random.uniform(k4, (1, 1), jnp.float32, -bound2, bound2)
    return w1, b1, w2, b2


def reference_forward(x, w1, b1, w2, b2):
    """Pure-JAX reference of the same forward pass (returns shape [B])."""
    h = jnp.maximum(x @ w1.T + b1[:, 0], 0.0)
    return jnp.sum(h * w2[:, 0], axis=-1) + b2[0, 0]


if __name__ == "__main__":
    key = jax.random.PRNGKey(0)
    INPUT_DIM, HIDDEN = 32, 18   # default options: layers=(18,), output dim 1

    # Small shapes (single full-array block, no padding) plus one multi-tile batch
    # with a ragged last tile (exercises grid = cdiv(B, tile_b) boundary masking).
    for B in (8, 50, 2 * _TILE_B_MAX + 77):
        kx, kp = jax.random.split(jax.random.fold_in(key, B))
        x = jax.random.normal(kx, (B, INPUT_DIM), jnp.float32)
        w1, b1, w2, b2 = init_params(kp, INPUT_DIM, HIDDEN)

        out = jax.block_until_ready(torch_mlp_forward_pallas(x, w1, b1, w2, b2))
        ref = reference_forward(x, w1, b1, w2, b2)
        assert out.shape == (B,), out.shape
        assert jnp.allclose(out, ref, atol=1e-4, rtol=1e-5), f"mismatch vs reference at B={B}"

        # Dispatcher (XLA for tiny B, Pallas otherwise) must agree as well.
        out2 = jax.block_until_ready(torch_mlp_forward(x, w1, b1, w2, b2))
        assert jnp.allclose(out2, ref, atol=1e-4, rtol=1e-5), f"dispatcher mismatch at B={B}"

    print("KERNEL_OK")
</pallas_src>

<mosaic_0001>
module attributes {stable_mosaic.version = 11 : i64} {
  func.func @_probe(%arg0: i32, %arg1: memref<8x128xf32, #tpu.memory_space<vmem>>, %arg2: memref<8x128xf32, #tpu.memory_space<vmem>>) attributes {dimension_semantics = [#tpu.dimension_semantics<core_parallel>], iteration_bounds = array<i64: 3>, scalar_prefetch = 0 : i64, scratch_operands = 0 : i64, tpu.core_type = #tpu.core_type<tc>, window_params = [{transform_indices = @transform_0, window_bounds = array<i64: 8, 128>}, {transform_indices = @transform_1, window_bounds = array<i64: 8, 128>}]} {
    %c0 = arith.constant 0 : index
    %c0_0 = arith.constant 0 : index
    %0 = vector.load %arg1[%c0, %c0_0] : memref<8x128xf32, #tpu.memory_space<vmem>>, vector<8x128xf32>
    %cst = arith.constant 1.000000e+00 : f32
    %1 = vector.broadcast %cst : f32 to vector<8x128xf32>
    %2 = arith.addf %0, %1 : vector<8x128xf32>
    %c0_1 = arith.constant 0 : index
    %c0_2 = arith.constant 0 : index
    %3 = vector.load %arg2[%c0_1, %c0_2] : memref<8x128xf32, #tpu.memory_space<vmem>>, vector<8x128xf32>
    tpu.vector_store %arg2[%c0_1, %c0_2], %2 {strides = array<i32>} : memref<8x128xf32, #tpu.memory_space<vmem>>, vector<8x128xf32>,
    return
  }
  func.func @transform_0(%arg0: i32) -> (i32, i32) {
    %c0_i32 = arith.constant 0 : i32
    %c0_i32_0 = arith.constant 0 : i32
    return %arg0, %c0_i32 : i32, i32
  }
  func.func @transform_1(%arg0: i32) -> (i32, i32) {
    %c0_i32 = arith.constant 0 : i32
    %c0_i32_0 = arith.constant 0 : i32
    return %arg0, %c0_i32 : i32, i32
  }
}

module attributes {stable_mosaic.version = 11 : i64} {
  func.func @_mlp_kernel(%arg0: i32, %arg1: memref<8x32xf32, #tpu.memory_space<vmem>>, %arg2: memref<18x32xf32, #tpu.memory_space<vmem>>, %arg3: memref<18x1xf32, #tpu.memory_space<vmem>>, %arg4: memref<18x1xf32, #tpu.memory_space<vmem>>, %arg5: memref<1x1xf32, #tpu.memory_space<smem>>, %arg6: memref<1x8xf32, #tpu.memory_space<vmem>>) attributes {dimension_semantics = [#tpu.dimension_semantics<parallel>], iteration_bounds = array<i64: 1>, scalar_prefetch = 0 : i64, scratch_operands = 0 : i64, tpu.core_type = #tpu.core_type<tc>, window_params = [{transform_indices = @transform_0, window_bounds = array<i64: 8, 32>}, {pipeline_mode = #tpu.pipeline_mode<synchronous>, transform_indices = @transform_1, window_bounds = array<i64: 18, 32>}, {pipeline_mode = #tpu.pipeline_mode<synchronous>, transform_indices = @transform_2, window_bounds = array<i64: 18, 1>}, {pipeline_mode = #tpu.pipeline_mode<synchronous>, transform_indices = @transform_3, window_bounds = array<i64: 18, 1>}, {transform_indices = @transform_4, window_bounds = array<i64: 1, 1>}, {transform_indices = @transform_5, window_bounds = array<i64: 1, 8>}]} {
    %c0 = arith.constant 0 : index
    %c0_0 = arith.constant 0 : index
    %0 = vector.load %arg2[%c0, %c0_0] : memref<18x32xf32, #tpu.memory_space<vmem>>, vector<18x32xf32>
    %c0_1 = arith.constant 0 : index
    %c0_2 = arith.constant 0 : index
    %1 = vector.load %arg1[%c0_1, %c0_2] : memref<8x32xf32, #tpu.memory_space<vmem>>, vector<8x32xf32>
    %cst = arith.constant dense<0.000000e+00> : vector<18x8xf32>
    %2 = tpu.matmul %0, %1, %cst {dimension_numbers = #tpu.dot_dimension_numbers<[1], [1], [0], [0], [0, 0, 1, 0], [], []>} : vector<18x32xf32>, vector<8x32xf32>, vector<18x8xf32> -> vector<18x8xf32>
    %c0_3 = arith.constant 0 : index
    %c0_4 = arith.constant 0 : index
    %3 = vector.load %arg3[%c0_3, %c0_4] : memref<18x1xf32, #tpu.memory_space<vmem>>, vector<18x1xf32>
    %4 = vector.broadcast %3 : vector<18x1xf32> to vector<18x8xf32>
    %5 = arith.addf %2, %4 : vector<18x8xf32>
    %cst_5 = arith.constant 0.000000e+00 : f32
    %6 = vector.broadcast %cst_5 : f32 to vector<18x8xf32>
    %7 = arith.maximumf %5, %6 : vector<18x8xf32>
    %c0_6 = arith.constant 0 : index
    %c0_7 = arith.constant 0 : index
    %8 = vector.load %arg4[%c0_6, %c0_7] : memref<18x1xf32, #tpu.memory_space<vmem>>, vector<18x1xf32>
    %9 = vector.broadcast %8 : vector<18x1xf32> to vector<18x8xf32>
    %10 = arith.mulf %7, %9 : vector<18x8xf32>
    %cst_8 = arith.constant dense<0.000000e+00> : vector<8xf32>
    %11 = vector.multi_reduction <add>, %10, %cst_8 [0] : vector<18x8xf32> to vector<8xf32>
    %12 = vector.shape_cast %11 : vector<8xf32> to vector<1x8xf32>
    %c0_9 = arith.constant 0 : index
    %c0_10 = arith.constant 0 : index
    %13 = memref.load %arg5[%c0_9, %c0_10] : memref<1x1xf32, #tpu.memory_space<smem>>
    %14 = vector.broadcast %13 : f32 to vector<1x8xf32>
    %15 = arith.addf %12, %14 : vector<1x8xf32>
    %c0_11 = arith.constant 0 : index
    %c0_12 = arith.constant 0 : index
    %16 = vector.load %arg6[%c0_11, %c0_12] : memref<1x8xf32, #tpu.memory_space<vmem>>, vector<1x8xf32>
    tpu.vector_store %arg6[%c0_11, %c0_12], %15 {strides = array<i32>} : memref<1x8xf32, #tpu.memory_space<vmem>>, vector<1x8xf32>,
    return
  }
  func.func @transform_0(%arg0: i32) -> (i32, i32) {
    %c0_i32 = arith.constant 0 : i32
    %c0_i32_0 = arith.constant 0 : i32
    return %arg0, %c0_i32 : i32, i32
  }
  func.func @transform_1(%arg0: i32) -> (i32, i32) {
    %c0_i32 = arith.constant 0 : i32
    %c0_i32_0 = arith.constant 0 : i32
    %c0_i32_1 = arith.constant 0 : i32
    return %c0_i32, %c0_i32_0 : i32, i32
  }
  func.func @transform_2(%arg0: i32) -> (i32, i32) {
    %c0_i32 = arith.constant 0 : i32
    %c0_i32_0 = arith.constant 0 : i32
    %c0_i32_1 = arith.constant 0 : i32
    return %c0_i32, %c0_i32_0 : i32, i32
  }
  func.func @transform_3(%arg0: i32) -> (i32, i32) {
    %c0_i32 = arith.constant 0 : i32
    %c0_i32_0 = arith.constant 0 : i32
    %c0_i32_1 = arith.constant 0 : i32
    return %c0_i32, %c0_i32_0 : i32, i32
  }
  func.func @transform_4(%arg0: i32) -> (i32, i32) {
    %c0_i32 = arith.constant 0 : i32
    %c0_i32_0 = arith.constant 0 : i32
    %c0_i32_1 = arith.constant 0 : i32
    return %c0_i32, %c0_i32_0 : i32, i32
  }
  func.func @transform_5(%arg0: i32) -> (i32, i32) {
    %c0_i32 = arith.constant 0 : i32
    %c0_i32_0 = arith.constant 0 : i32
    return %c0_i32, %arg0 : i32, i32
  }
}

</mosaic_0001>

<bundles_post_ra>
// kernel: _forward_pallas.1
= control target key start
LH: loop header
LB: loop body
LE: loop exit
PB: predicated region body
PF: predicated region fallthrough
CT: control target
= control target key end

     0   :  { %vm44_vm0 = vcmask 261120   ;;  %v178_v4 = vmov 0   ;;  %s252_s0 = inlined_call_operand.vmem [shape: f32[8,32], index: 0, kind: input, shape index: {}]   ;;  %s253_s1 = inlined_call_operand.vmem [shape: f32[18,32], index: 1, kind: input, shape index: {}]   ;;  %s254_s2 = inlined_call_operand.vmem [shape: f32[18,1], index: 2, kind: input, shape index: {}]   ;;  %s255_s3 = inlined_call_operand.vmem [shape: f32[18,1], index: 3, kind: input, shape index: {}]   ;;  %s256_s4 = inlined_call_operand.<no memory space> [shape: f32[1,1], index: 4, kind: input, shape index: {}]   ;;  %s257_s5 = inlined_call_operand.hbm [shape: f32[1,8], index: 5, kind: output, shape index: {}]  }
   0x1   :  { %v25_v0 = vld [vmem:[%s252_s0] sm:$0xff]  ;;  %v23_v3 = vld [vmem:[%s253_s1 + $0x8] sm:$0xff]  ;;  %149 = vset.pattern.permute.xlu0 %v178_v4  ;;  %v24_v5 = vld [vmem:[%s253_s1 + $0x10] sm:$0x3]  ;;  %150 = vset.pattern.permute.xlu1 %v178_v4 }
   0x2   :  { %v26_v1 = vld [vmem:[%s254_s2] sm:$0xff]  ;;  %141 = vmatpush.xpose.msk.msra.mxu0 %vm44_vm0, %v25_v0  ;;  %145 = vmatpush.xpose.msk.msra.mxu1 %vm44_vm0, %v25_v0  ;;  %v28_v6 = vld [vmem:[%s254_s2 + $0x10] sm:$0x3] }
   0x3   :  { %v22_v2 = vld [vmem:[%s253_s1] sm:$0xff]  ;;  %146 = vmatpush.xpose.msk.msra.mxu2 %vm44_vm0, %v25_v0  ;;  %31 = vperm.xlu0 %149, %v26_v1  }
   0x4   :  { %11 = vsyncpa [#allocation4], 0  ;;  %v87_v7 = vld [vmem:[%s255_s3 + $0x8] sm:$0xff]  ;;  %41 = vperm.xlu1 %150, %v28_v6   ;;  %151 = vset.pattern.permute.xlu2 %v178_v4  ;;  %v86_v9 = vld [vmem:[%s255_s3] sm:$0xff]  ;;  %vm107_vm1 = vcmask 64512   ;;  %vm111_vm2 = vcmask 58368   ;;  %v121_v39 = vstv %s256_s4 }
   0x5   :  { %142 = vmatmul.msk.f32.vlgmr.msra.gmra.mxu0 %vm44_vm0, %v22_v2  ;;  %143 = vmatmul.msk.f32.vlgmr.msra.gmra.mxu1 %vm44_vm0, %v23_v3  ;;  %v27_v8 = vld [vmem:[%s254_s2 + $0x8] sm:$0xff]  ;;  %v88_v10 = vld [vmem:[%s255_s3 + $0x10] sm:$0x3]  ;;  %s179_s11 = smov [#allocation3]   ;;  %s132_s15 = sshll.u32 %s257_s5, 4  ;;  %vm123_vm3 = vcmask 57344   ;;  %s133_s15 = int_to_ptr.hbm [resolvable:$true] %s132_s15 }
   0x6   :  { %144 = vmatmul.msk.f32.vlgmr.msra.gmra.mxu2 %vm44_vm0, %v24_v5  ;;  %96 = vperm.xlu2 %151, %v87_v7   ;;  %s130_s12 = sshll.u32 %s179_s11, 4  ;;  %s131_s12 = int_to_ptr.vmem [resolvable:$true] %s130_s12 }
   0xb   :  { %36 = vperm.xlu0 %149, %v27_v8  }
   0xc   :  { %91 = vperm.xlu1 %150, %v86_v9  }
   0xe   :  { %101 = vperm.xlu2 %151, %v88_v10  }
  0x60   :  { %v97_v16 = vpop.permute.xlu2 %96 }
  0x68   :  { %v102_v29 = vpop.permute.xlu2 %101 }
  0x75   :  { %v32_v11 = vpop.permute.xlu0 %31 }
  0x76   :  { %v42_v12 = vpop.permute.xlu1 %41 }
  0x7d   :  { %v37_v13 = vpop.permute.xlu0 %36 }
  0x7e   :  { %v92_v21 = vpop.permute.xlu1 %91 }
  0x82   :  { %v74_v14 = vpop.f32.mrf.mxu0  ;;  %v77_v15 = vpop.f32.mrf.mxu1 }
  0x83   :  { %v75_v17 = vadd.f32 %v74_v14, %v32_v11  ;;  %v78_v18 = vadd.f32 %v77_v15, %v37_v13 }
  0x85   :  { %v83_v19 = vmax.f32 %v75_v17, 0.0  ;;  %v84_v20 = vmax.f32 %v78_v18, 0.0 }
  0x87   :  { %v104_v22 = vmul.f32 %v92_v21, %v83_v19  ;;  %v105_v23 = vmul.f32 %v97_v16, %v84_v20 }
  0x89   :  { %v80_v24 = vpop.f32.mrf.mxu2  ;;  %v108_v26 = vsel %vm107_vm1, %v104_v22, 0.0  ;;  %v109_v27 = vsel %vm107_vm1, %v105_v23, 0.0 }
  0x8a   :  { %v81_v25 = vadd.f32 %v80_v24, %v42_v12  ;;  %v110_v31 = vadd.f32 %v109_v27, %v108_v26 }
  0x8c   :  { %v85_v28 = vmax.f32 %v81_v25, 0.0 }
  0x8e   :  { %v106_v30 = vmul.f32 %v102_v29, %v85_v28 }
  0x90   :  { %v112_v32 = vsel %vm111_vm2, %v106_v30, 0.0 }
  0x91   :  { %v113_v33 = vadd.f32 %v112_v32, %v110_v31 }
  0x93   :  { %v114_v34 = vrot.slane %v113_v33, 4 }
  0x95   :  { %v115_v35 = vadd.f32 %v114_v34, %v113_v33 }
  0x97   :  { %v116_v36 = vrot.slane %v115_v35, 2 }
  0x99   :  { %v117_v37 = vadd.f32 %v116_v36, %v115_v35 }
  0x9b   :  { %v118_v38 = vrot.slane %v117_v37, 1 }
  0x9d   :  { %v119_v40 = vadd.f32 %v118_v38, %v117_v37 }
  0x9f   :  { %v122_v41 = vadd.f32 %v121_v39, %v119_v40 }
  0xa1   :  { %124 = vst.msk [vmem:[#allocation3] sm:$0x1] %vm123_vm3, %v122_v41 }
  0xa2   :  { %135 = dma.vmem_to_hbm [thread:$0]  %s131_s12, 16, %s133_s15, [#allocation4]  }
  0xa3   :  { %176 = dma.done.wait [#allocation4], 16  }
  0xa4   :  { %177 = vsyncadd [#allocation4], 4294967280 }
  0xa5   :  { %140 = vsyncpa [#allocation4], 1 }

</bundles_post_ra>
